<compile_context>
chip_gen: v6e
topology: v6e:2x2x1
jax: 0.10.0
libtpu: 0.0.40
codegen_flags: <defaults>
</compile_context>

<pallas_src>
import math

import jax
import jax.numpy as jnp
from jax.experimental import pallas as pl
from jax.experimental.pallas import tpu as pltpu


def _round_up(n: int, m: int) -> int:
    return ((n + m - 1) // m) * m


# --------------------------------------------------------------------------
# Kernel: one batch tile, both layers fused (MXU matmuls + VPU bias/relu).
# --------------------------------------------------------------------------
def _qnet_kernel(x_ref, w1_ref, b1_ref, w2_ref, b2_ref, o_ref):
    a_out = o_ref.shape[-1]                              # n_actions (static)
    x = x_ref[...].astype(w1_ref.dtype)                  # (tm, D) f32 -> bf16 (in-kernel)
    h = jnp.dot(x, w1_ref[...],
                preferred_element_type=jnp.float32)      # (tm, Hp) f32 acc
    h = jnp.maximum(h + b1_ref[...], 0.0)                # bias + ReLU (VPU)
    q = jnp.dot(h.astype(w2_ref.dtype), w2_ref[...],
                preferred_element_type=jnp.float32)      # (tm, Ap) f32 acc
    # Narrow f32 store: only the real action columns go back to HBM.
    o_ref[...] = (q[:, :a_out] + b2_ref[:, :a_out]).astype(o_ref.dtype)


# --------------------------------------------------------------------------
# Parameter init / packing
# --------------------------------------------------------------------------
def init_qnetwork_params(key, input_dim, n_actions, hidden_dim):
    """PyTorch nn.Linear-style init (uniform(+-1/sqrt(fan_in))), stored
    pre-transposed as [in, out]."""
    k1, k2, k3, k4 = jax.random.split(key, 4)
    bound1 = 1.0 / math.sqrt(input_dim)
    bound2 = 1.0 / math.sqrt(hidden_dim)
    w1 = jax.random.uniform(k1, (input_dim, hidden_dim), jnp.float32, -bound1, bound1)
    b1 = jax.random.uniform(k2, (hidden_dim,), jnp.float32, -bound1, bound1)
    w2 = jax.random.uniform(k3, (hidden_dim, n_actions), jnp.float32, -bound2, bound2)
    b2 = jax.random.uniform(k4, (n_actions,), jnp.float32, -bound2, bound2)
    return w1, b1, w2, b2


def pack_qnetwork_params(params, compute_dtype=jnp.bfloat16):
    """Pad only the lane dims that must be 128 (hidden H, W2/b2 output cols);
    the contraction dim D is left un-padded.  Weights -> bf16 (MXU-native);
    biases stay f32 (added post-accumulation).  Done once at init."""
    w1, b1, w2, b2 = params
    D, H = w1.shape
    A = w2.shape[1]
    Hp, Ap = _round_up(H, 128), _round_up(A, 128)
    w1p = jnp.zeros((D, Hp), compute_dtype).at[:, :H].set(w1.astype(compute_dtype))
    b1p = jnp.zeros((1, Hp), jnp.float32).at[0, :H].set(b1.astype(jnp.float32))
    w2p = jnp.zeros((Hp, Ap), compute_dtype).at[:H, :A].set(w2.astype(compute_dtype))
    b2p = jnp.zeros((1, Ap), jnp.float32).at[0, :A].set(b2.astype(jnp.float32))
    return dict(w1=w1p, b1=b1p, w2=w2p, b2=b2p,
                dims=(D, H, A), compute_dtype=compute_dtype)


# --------------------------------------------------------------------------
# Forward passes
# --------------------------------------------------------------------------
def _qnetwork_forward_jnp(x2d, packed):
    """Plain fused-jnp path (also the correctness reference): same bf16
    rounding / intermediate casts as the kernel."""
    D, H, A = packed["dims"]
    cdt = packed["compute_dtype"]
    w1 = packed["w1"][:, :H].astype(jnp.float32)
    b1 = packed["b1"][:, :H]
    w2 = packed["w2"][:H, :A].astype(jnp.float32)
    b2 = packed["b2"][:, :A]
    x = x2d.astype(cdt).astype(jnp.float32)
    h = jnp.maximum(x @ w1 + b1, 0.0).astype(cdt).astype(jnp.float32)
    return h @ w2 + b2


def _pick_tm(B: int, block_rows: int) -> int:
    """Batch tile: multiple of 16 (bf16 sublane packing), >= 2 grid steps
    whenever B allows (v7x megacore), minimal padding for B just above a
    tile boundary, capped at block_rows."""
    n_tiles = max(2, pl.cdiv(B, block_rows))
    tm = _round_up(pl.cdiv(B, n_tiles), 16)
    return max(16, min(tm, block_rows))


def _qnetwork_forward_pallas(x2d, packed, *, block_rows=1024):
    D, H, A = packed["dims"]
    w1, b1, w2, b2 = packed["w1"], packed["b1"], packed["w2"], packed["b2"]
    Hp, Ap = w2.shape

    B = x2d.shape[0]
    tm = _pick_tm(B, block_rows)

    # No batch padding in general: the grid uses cdiv and Pallas masks the
    # partial last block.  Only when B < tm (i.e. B < 16) pad a few rows so a
    # single block never exceeds the array extent.
    if B < tm:
        x_in = jnp.zeros((tm, D), x2d.dtype).at[:B, :].set(x2d)
    else:
        x_in = x2d
    Bk = x_in.shape[0]
    grid = (pl.cdiv(Bk, tm),)

    # Advisory cost hint for XLA scheduling around the custom call.
    itemsize = jnp.dtype(x_in.dtype).itemsize
    flops = 2 * Bk * (D * Hp + Hp * Ap)
    bytes_accessed = (Bk * D * itemsize            # x read
                      + Bk * A * 4                 # q write (f32, narrow)
                      + (w1.size + w2.size) * 2    # bf16 weights (resident)
                      + (b1.size + b2.size) * 4)   # f32 biases

    out = pl.pallas_call(
        _qnet_kernel,
        out_shape=jax.ShapeDtypeStruct((Bk, A), jnp.float32),
        grid=grid,
        in_specs=[
            pl.BlockSpec((tm, D), lambda i: (i, 0)),   # x tile: full-extent (un-padded) D
            pl.BlockSpec((D, Hp), lambda i: (0, 0)),   # W1 (VMEM-resident)
            pl.BlockSpec((1, Hp), lambda i: (0, 0)),   # b1
            pl.BlockSpec((Hp, Ap), lambda i: (0, 0)),  # W2 (VMEM-resident)
            pl.BlockSpec((1, Ap), lambda i: (0, 0)),   # b2
        ],
        out_specs=pl.BlockSpec((tm, A), lambda i: (i, 0)),  # narrow (B, A) f32 output
        compiler_params=pltpu.CompilerParams(
            dimension_semantics=("parallel",)),        # v7x: 2 TCs split the batch
        cost_estimate=pl.CostEstimate(
            flops=flops, transcendentals=0, bytes_accessed=bytes_accessed),
    )(x_in, w1, b1, w2, b2)

    return out[:B] if Bk != B else out


def qnetwork_forward(x, packed, *, block_rows=1024, force_pallas=False):
    """x: [input_dim] or [batch, input_dim] -> [n_actions] or [batch, n_actions]."""
    squeeze = x.ndim == 1
    xb = x[None, :] if squeeze else x
    if xb.shape[0] <= 8 and not force_pallas:
        # Tiny-batch path: the pallas_call boundary costs more than the math;
        # let XLA fuse the two GEMVs with surrounding (e.g. argmax) ops.
        q = _qnetwork_forward_jnp(xb, packed)
    else:
        q = _qnetwork_forward_pallas(xb, packed, block_rows=block_rows)
    return q[0] if squeeze else q


# --------------------------------------------------------------------------
# Self-test
# --------------------------------------------------------------------------
if __name__ == "__main__":
    input_dim, n_actions, hidden_dim = 16, 6, 32

    key = jax.random.PRNGKey(0)
    pkey, xkey = jax.random.split(key)
    params = init_qnetwork_params(pkey, input_dim, n_actions, hidden_dim)
    packed = pack_qnetwork_params(params)

    # 1) Small batch [2, 16], forced through the Pallas kernel (tiny-pad path).
    x = jax.random.normal(xkey, (2, input_dim), jnp.float32)
    q = jax.block_until_ready(qnetwork_forward(x, packed, force_pallas=True))
    q_ref = _qnetwork_forward_jnp(x, packed)
    assert q.shape == (2, n_actions)
    assert jnp.allclose(q, q_ref, atol=1e-3, rtol=1e-3)

    # 2) Batch 256 with block_rows=128 -> grid=(2,), megacore-parallel,
    #    no batch padding at all.
    xb = jax.random.normal(jax.random.fold_in(xkey, 1), (256, input_dim), jnp.float32)
    qb = jax.block_until_ready(qnetwork_forward(xb, packed, block_rows=128))
    assert qb.shape == (256, n_actions)
    assert jnp.allclose(qb, _qnetwork_forward_jnp(xb, packed), atol=1e-3, rtol=1e-3)

    # 3) Batch 260 (not a tile multiple) -> exercises the masked partial last
    #    block with zero wrapper-side padding.
    xc = jax.random.normal(jax.random.fold_in(xkey, 2), (260, input_dim), jnp.float32)
    qc = jax.block_until_ready(qnetwork_forward(xc, packed))
    assert qc.shape == (260, n_actions)
    assert jnp.allclose(qc, _qnetwork_forward_jnp(xc, packed), atol=1e-3, rtol=1e-3)

    # 4) Single latent belief state [input_dim] -> [n_actions] (docstring case).
    x1 = x[0]
    q1 = jax.block_until_ready(qnetwork_forward(x1, packed, force_pallas=True))
    assert q1.shape == (n_actions,)
    assert jnp.allclose(q1, q[0], atol=1e-3, rtol=1e-3)

    print("KERNEL_OK")
</pallas_src>

<mosaic_0001>
module attributes {stable_mosaic.version = 11 : i64} {
  func.func @_qnet_kernel(%arg0: i32, %arg1: memref<16x16xf32, #tpu.memory_space<vmem>>, %arg2: memref<16x128xbf16, #tpu.memory_space<vmem>>, %arg3: memref<1x128xf32, #tpu.memory_space<vmem>>, %arg4: memref<128x128xbf16, #tpu.memory_space<vmem>>, %arg5: memref<1x128xf32, #tpu.memory_space<vmem>>, %arg6: memref<16x6xf32, #tpu.memory_space<vmem>>) attributes {dimension_semantics = [#tpu.dimension_semantics<parallel>], iteration_bounds = array<i64: 1>, scalar_prefetch = 0 : i64, scratch_operands = 0 : i64, tpu.core_type = #tpu.core_type<tc>, window_params = [{transform_indices = @transform_0, window_bounds = array<i64: 16, 16>}, {pipeline_mode = #tpu.pipeline_mode<synchronous>, transform_indices = @transform_1, window_bounds = array<i64: 16, 128>}, {pipeline_mode = #tpu.pipeline_mode<synchronous>, transform_indices = @transform_2, window_bounds = array<i64: 1, 128>}, {pipeline_mode = #tpu.pipeline_mode<synchronous>, transform_indices = @transform_3, window_bounds = array<i64: 128, 128>}, {pipeline_mode = #tpu.pipeline_mode<synchronous>, transform_indices = @transform_4, window_bounds = array<i64: 1, 128>}, {transform_indices = @transform_5, window_bounds = array<i64: 16, 6>}]} {
    %c0 = arith.constant 0 : index
    %c0_0 = arith.constant 0 : index
    %0 = vector.load %arg1[%c0, %c0_0] : memref<16x16xf32, #tpu.memory_space<vmem>>, vector<16x16xf32>
    %1 = arith.truncf %0 : vector<16x16xf32> to vector<16x16xbf16>
    %c0_1 = arith.constant 0 : index
    %c0_2 = arith.constant 0 : index
    %2 = vector.load %arg2[%c0_1, %c0_2] : memref<16x128xbf16, #tpu.memory_space<vmem>>, vector<16x128xbf16>
    %cst = arith.constant dense<0.000000e+00> : vector<16x128xf32>
    %3 = tpu.matmul %1, %2, %cst {dimension_numbers = #tpu.dot_dimension_numbers<[1], [0], [0], [1], [0, 0, 1, 1], [], []>} : vector<16x16xbf16>, vector<16x128xbf16>, vector<16x128xf32> -> vector<16x128xf32>
    %c0_3 = arith.constant 0 : index
    %c0_4 = arith.constant 0 : index
    %4 = vector.load %arg3[%c0_3, %c0_4] : memref<1x128xf32, #tpu.memory_space<vmem>>, vector<1x128xf32>
    %5 = vector.broadcast %4 : vector<1x128xf32> to vector<16x128xf32>
    %6 = arith.addf %3, %5 : vector<16x128xf32>
    %cst_5 = arith.constant 0.000000e+00 : f32
    %7 = vector.broadcast %cst_5 : f32 to vector<16x128xf32>
    %8 = arith.maximumf %6, %7 : vector<16x128xf32>
    %9 = arith.truncf %8 : vector<16x128xf32> to vector<16x128xbf16>
    %c0_6 = arith.constant 0 : index
    %c0_7 = arith.constant 0 : index
    %10 = vector.load %arg4[%c0_6, %c0_7] : memref<128x128xbf16, #tpu.memory_space<vmem>>, vector<128x128xbf16>
    %cst_8 = arith.constant dense<0.000000e+00> : vector<16x128xf32>
    %11 = tpu.matmul %9, %10, %cst_8 {dimension_numbers = #tpu.dot_dimension_numbers<[1], [0], [0], [1], [0, 0, 1, 1], [], []>} : vector<16x128xbf16>, vector<128x128xbf16>, vector<16x128xf32> -> vector<16x128xf32>
    %12 = vector.extract_strided_slice %11 {offsets = [0, 0], sizes = [16, 6], strides = [1, 1]} : vector<16x128xf32> to vector<16x6xf32>
    %c0_9 = arith.constant 0 : index
    %c0_10 = arith.constant 0 : index
    %13 = vector.load %arg5[%c0_9, %c0_10] : memref<1x128xf32, #tpu.memory_space<vmem>>, vector<1x6xf32>
    %14 = vector.broadcast %13 : vector<1x6xf32> to vector<16x6xf32>
    %15 = arith.addf %12, %14 : vector<16x6xf32>
    %c0_11 = arith.constant 0 : index
    %c0_12 = arith.constant 0 : index
    %16 = vector.load %arg6[%c0_11, %c0_12] : memref<16x6xf32, #tpu.memory_space<vmem>>, vector<16x6xf32>
    tpu.vector_store %arg6[%c0_11, %c0_12], %15 {strides = array<i32>} : memref<16x6xf32, #tpu.memory_space<vmem>>, vector<16x6xf32>,
    return
  }
  func.func @transform_0(%arg0: i32) -> (i32, i32) {
    %c0_i32 = arith.constant 0 : i32
    %c0_i32_0 = arith.constant 0 : i32
    return %arg0, %c0_i32 : i32, i32
  }
  func.func @transform_1(%arg0: i32) -> (i32, i32) {
    %c0_i32 = arith.constant 0 : i32
    %c0_i32_0 = arith.constant 0 : i32
    %c0_i32_1 = arith.constant 0 : i32
    return %c0_i32, %c0_i32_0 : i32, i32
  }
  func.func @transform_2(%arg0: i32) -> (i32, i32) {
    %c0_i32 = arith.constant 0 : i32
    %c0_i32_0 = arith.constant 0 : i32
    %c0_i32_1 = arith.constant 0 : i32
    return %c0_i32, %c0_i32_0 : i32, i32
  }
  func.func @transform_3(%arg0: i32) -> (i32, i32) {
    %c0_i32 = arith.constant 0 : i32
    %c0_i32_0 = arith.constant 0 : i32
    %c0_i32_1 = arith.constant 0 : i32
    return %c0_i32, %c0_i32_0 : i32, i32
  }
  func.func @transform_4(%arg0: i32) -> (i32, i32) {
    %c0_i32 = arith.constant 0 : i32
    %c0_i32_0 = arith.constant 0 : i32
    %c0_i32_1 = arith.constant 0 : i32
    return %c0_i32, %c0_i32_0 : i32, i32
  }
  func.func @transform_5(%arg0: i32) -> (i32, i32) {
    %c0_i32 = arith.constant 0 : i32
    %c0_i32_0 = arith.constant 0 : i32
    return %arg0, %c0_i32 : i32, i32
  }
}

</mosaic_0001>

<bundles_post_ra>
// kernel: tpu_custom_call.1
= control target key start
LH: loop header
LB: loop body
LE: loop exit
PB: predicated region body
PF: predicated region fallthrough
CT: control target
= control target key end

     0   :  { %10 = vsyncpa [#allocation3], 0  ;;  %s442_s0 = inlined_call_operand.hbm [shape: f32[16,16], index: 0, kind: input, shape index: {}]   ;;  %s443_s1 = inlined_call_operand.hbm [shape: bf16[16,128], index: 1, kind: input, shape index: {}]   ;;  %s444_s2 = inlined_call_operand.vmem [shape: f32[1,128], index: 2, kind: input, shape index: {}]   ;;  %s445_s3 = inlined_call_operand.hbm [shape: bf16[128,128], index: 3, kind: input, shape index: {}]   ;;  %s446_s4 = inlined_call_operand.vmem [shape: f32[1,128], index: 4, kind: input, shape index: {}]   ;;  %s447_s5 = inlined_call_operand.vmem [shape: f32[16,6], index: 5, kind: output, shape index: {}]  }
   0x1   :  { %11 = vsyncpa [#allocation5], 0  ;;  %s382_s18 = smov [#allocation4]  }
   0x2   :  { %s29_s19 = sshll.u32 %s382_s18, 4  ;;  %s30_s19 = int_to_ptr.vmem [resolvable:$true] %s29_s19 }
   0x3   :  { %s326_s20 = scalar_lea.vmem %s30_s19, 128  ;;  %p331_p1 = scmp.lt.s32.totalorder %s30_s19, %s30_s19 }
   0x4   :  { %p327_p0 = scmp.ne.s32.totalorder %s30_s19, %s326_s20  ;;  %p332_p2 = scmp.lt.s32.totalorder %s326_s20, %s326_s20 }
   0x6   :  { %p333_p3 = por %p332_p2, %p331_p1 }
   0x8   :  { %p334_p4 = pnand %p333_p3, %p327_p0 }
   0xa   :  { %337 = shalt.err (!%p334_p4)
}
   0xb   :  { %s383_s21 = smov 64   ;;  %s384_s22 = smov 4  }
   0xc   :  { %35 = dma.hbm_to_vmem [thread:$0]  %s443_s1, 128, %s30_s19, [#allocation5], %s383_s21, %s383_s21, %s384_s22  }
   0xd   :  { %s385_s25 = smov [#allocation2]  }
   0xe   :  { %s17_s26 = sshll.u32 %s385_s25, 4  ;;  %s18_s26 = int_to_ptr.vmem [resolvable:$true] %s17_s26 }
   0xf   :  { %s346_s27 = scalar_lea.vmem %s18_s26, 256  ;;  %p351_p6 = scmp.lt.s32.totalorder %s18_s26, %s18_s26 }
  0x10   :  { %p347_p5 = scmp.ne.s32.totalorder %s18_s26, %s346_s27  ;;  %p352_p7 = scmp.lt.s32.totalorder %s346_s27, %s346_s27 }
  0x12   :  { %p353_p8 = por %p352_p7, %p351_p6 }
  0x14   :  { %p354_p9 = pnand %p353_p8, %p347_p5 }
  0x16   :  { %357 = shalt.err (!%p354_p9)
}
  0x17   :  { %s386_s28 = smov 128   ;;  %s387_s29 = smov 8  }
  0x18   :  { %23 = dma.hbm_to_vmem [thread:$0]  %s442_s0, 256, %s18_s26, [#allocation3], %s386_s28, %s386_s28, %s387_s29  }
  0x19   :  { %s388_s7 = smov [#allocation6]  }
  0x1a   :  { %s43_s8 = sshll.u32 %s388_s7, 4  ;;  %s44_s8 = int_to_ptr.vmem [resolvable:$true] %s43_s8 }
  0x1b   :  { %s366_s1 = scalar_lea.vmem %s44_s8, 1024  ;;  %p371_p11 = scmp.lt.s32.totalorder %s44_s8, %s44_s8 }
  0x1c   :  { %p367_p10 = scmp.ne.s32.totalorder %s44_s8, %s366_s1  ;;  %p372_p12 = scmp.lt.s32.totalorder %s366_s1, %s366_s1 }
  0x1e   :  { %p373_p13 = por %p372_p12, %p371_p11 }
  0x20   :  { %p374_p0 = pnand %p373_p13, %p367_p10 }
  0x22   :  { %377 = shalt.err (!%p374_p0)
}
  0x23   :  { %49 = dma.hbm_to_vmem [thread:$0]  %s445_s3, 1024, %s44_s8, [#allocation5], %s383_s21, %s383_s21, %s384_s22  }
  0x24   :  { %378 = dma.done.wait [#allocation3], 256  }
  0x25   :  { %379 = vsyncadd [#allocation3], 4294967040 }
  0x26   :  { %380 = dma.done.wait [#allocation5], 1152  }
  0x27   :  { %381 = vsyncadd [#allocation5], 4294966144  ;;  %v389_v0 = vmov 0.0   ;;  %vm390_vm0 = vmmov 0   ;;  %v309_v1 = vld [vmem:[#allocation4] sm:$0xff]   ;;  %v62_v2 = vld [vmem:[#allocation2] sm:$0xff] }
  0x28   :  { %274 = vmatprep.subr.bf16.mxu0 %v389_v0  ;;  %276 = vmatprep.mubr.msk.bf16.mxu0 %vm390_vm0, %v389_v0  ;;  %v63_v3 = vld [vmem:[#allocation2 + $0x8] sm:$0xff]  ;;  %vm80_vm1 = vcmask 130048   ;;  %v310_v5 = vld [vmem:[#allocation6 + $0x38] sm:$0xff]   ;;  %v312_v7 = vld [vmem:[#allocation6 + $0x28] sm:$0xff]   ;;  %vm242_vm2 = vcmask 48128  }
  0x29   :  { %280 = vmatprep.subr.bf16.mxu1 %v389_v0  ;;  %296 = vmatprep.mubr.msk.bf16.mxu1 %vm390_vm0, %v389_v0  ;;  %v64_v4 = vpack.c.bf16 %v63_v3, %v62_v2  ;;  %v311_v6 = vld [vmem:[#allocation6 + $0x30] sm:$0xff]   ;;  %v313_v8 = vld [vmem:[#allocation6 + $0x20] sm:$0xff]   ;;  %v314_v9 = vld [vmem:[#allocation6 + $0x18] sm:$0xff]  }
  0x2a   :  { %275 = vmatpush3.bf16.msra.mxu0 %v309_v1  ;;  %281 = vmatpush3.bf16.msra.mxu1 %v310_v5  ;;  %v315_v10 = vld [vmem:[#allocation6 + $0x10] sm:$0xff]   ;;  %v316_v11 = vld [vmem:[#allocation6 + $0x8] sm:$0xff]   ;;  %v317_v12 = vld [vmem:[#allocation6] sm:$0xff]  }
  0x2b   :  { %282 = vmatprep.subr.bf16.mxu1 %v389_v0  ;;  %v251_v13 = vld [vmem:[%s444_s2] ss:$0 sm:$0xff] }
  0x2c   :  { %v262_v23 = vld [vmem:[%s446_s4] ss:$0 sm:$0xff] }
  0x2d   :  { %277 = vmatmul.mubr.msk.bf16.vlgmr.msra.gmra.mxu0 %vm80_vm1, %v64_v4 }
  0x2e   :  { %283 = vmatpush3.bf16.msra.mxu1 %v311_v6 }
  0x2f   :  { %284 = vmatprep.subr.bf16.mxu1 %v389_v0 }
  0x32   :  { %285 = vmatpush3.bf16.msra.mxu1 %v312_v7 }
  0x33   :  { %286 = vmatprep.subr.bf16.mxu1 %v389_v0 }
  0x36   :  { %287 = vmatpush3.bf16.msra.mxu1 %v313_v8 }
  0x37   :  { %288 = vmatprep.subr.bf16.mxu1 %v389_v0 }
  0x3a   :  { %289 = vmatpush3.bf16.msra.mxu1 %v314_v9 }
  0x3b   :  { %290 = vmatprep.subr.bf16.mxu1 %v389_v0 }
  0x3e   :  { %291 = vmatpush3.bf16.msra.mxu1 %v315_v10 }
  0x3f   :  { %292 = vmatprep.subr.bf16.mxu1 %v389_v0 }
  0x42   :  { %293 = vmatpush3.bf16.msra.mxu1 %v316_v11 }
  0x43   :  { %294 = vmatprep.subr.bf16.mxu1 %v389_v0 }
  0x46   :  { %295 = vmatpush3.bf16.msra.mxu1 %v317_v12 }
  0xed   :  { %v118_v14 = vpop.f32.mrf.mxu0 }
  0xee   :  { %v119_v16 = vadd.f32 %v251_v13, %v118_v14 }
  0xef   :  { %v278_v15 = vpop.f32.mrf.mxu0 }
  0xf0   :  { %v125_v20 = vmax.f32 %v119_v16, 0.0 }
  0xf1   :  { %v121_v17 = vpop.f32.mrf.mxu0 }
  0xf2   :  { %v122_v18 = vadd.f32 %v251_v13, %v121_v17 }
  0xf3   :  { %v279_v19 = vpop.f32.mrf.mxu0 }
  0xf4   :  { %v126_v21 = vmax.f32 %v122_v18, 0.0 }
  0xf6   :  { %v127_v22 = vpack.c.bf16 %v126_v21, %v125_v20 }
  0xf8   :  { %297 = vmatmul.mubr.bf16.vlgmr.msra.gmra.mxu1 %v127_v22 }
 0x1b8   :  { %v226_v24 = vpop.f32.mrf.mxu1 }
 0x1b9   :  { %v240_v25 = vadd.f32 %v262_v23, %v226_v24 }
 0x1ba   :  { %v298_v26 = vpop.f32.mrf.mxu1 }
 0x1bb   :  { %243 = vst.msk [vmem:[%s447_s5] sm:$0xff] %vm242_vm2, %v240_v25 }
 0x1bc   :  { %v229_v27 = vpop.f32.mrf.mxu1 }
 0x1bd   :  { %v241_v28 = vadd.f32 %v262_v23, %v229_v27 }
 0x1be   :  { %v299_v29 = vpop.f32.mrf.mxu1 }
 0x1bf   :  { %244 = vst.msk [vmem:[%s447_s5 + $0x8] sm:$0xff] %vm242_vm2, %v241_v28 }
 0x1c0   :  { %249 = vsyncpa [#allocation3], 1 }
 0x1c1   :  { %250 = vsyncpa [#allocation5], 1 }

</bundles_post_ra>
